<compile_context>
chip_gen: v7x
topology: tpu7x:2x2x1
jax: 0.10.0
libtpu: 0.0.40
codegen_flags: <defaults>
</compile_context>

<pallas_src>
import functools

import jax
import jax.numpy as jnp
from jax.experimental import pallas as pl
from jax.experimental.pallas import tpu as pltpu


def _accumulate(x_ref, sum_acc, max_acc, n_full, partial_width, acc_lanes):
    """Accumulate `n_full` full acc_lanes-wide chunks plus one optional partial
    chunk (all extents are static Python ints) into the running sum / max."""
    if n_full > 0:
        if n_full <= 64:
            for k in range(n_full):                      # static unroll
                lo = k * acc_lanes
                chunk = x_ref[:, lo:lo + acc_lanes]
                sum_acc[...] += chunk.astype(jnp.float32)
                max_acc[...] = jnp.maximum(max_acc[...], chunk)
        else:
            @pl.loop(0, n_full)
            def _chunk(k):
                off = pl.multiple_of(k * acc_lanes, acc_lanes)
                chunk = x_ref[:, pl.ds(off, acc_lanes)]
                sum_acc[...] += chunk.astype(jnp.float32)
                max_acc[...] = jnp.maximum(max_acc[...], chunk)
    if partial_width > 0:
        # Ragged tail chunk (only on the last HW tile): mask invalid lanes
        # with 0 for the sum and -inf for the max.
        lo = n_full * acc_lanes
        chunk = x_ref[:, lo:lo + acc_lanes]
        lane = jax.lax.broadcasted_iota(jnp.int32, chunk.shape, 1)
        valid = lane < partial_width
        sum_acc[...] += jnp.where(valid, chunk.astype(jnp.float32), 0.0)
        max_acc[...] = jnp.maximum(
            max_acc[...],
            jnp.where(valid, chunk, jnp.array(-jnp.inf, dtype=chunk.dtype)))


def _channel_attention_kernel(x_ref, w1t_ref, w2t_ref, out_ref,
                              sum_acc, max_acc, *,
                              hw_total, tile_hw, acc_lanes, b_blk, channels):
    # x_ref:   (b_blk*C, tile_hw)  activation dtype (streamed tile)
    # w1t_ref: (C, Cr)  fc1 weight, pre-transposed   w2t_ref: (Cr, C)
    # out_ref: (b_blk, C)
    # sum_acc: (b_blk*C, acc_lanes) f32   max_acc: same shape, native dtype
    hw_i = pl.program_id(1)
    n_hw = (hw_total + tile_hw - 1) // tile_hw        # static

    @pl.when(hw_i == 0)
    def _init():
        sum_acc[...] = jnp.zeros_like(sum_acc)
        max_acc[...] = jnp.full_like(max_acc, -jnp.inf)

    chunks_per_tile = tile_hw // acc_lanes
    last_start = (n_hw - 1) * tile_hw
    valid_last = hw_total - last_start                # in (0, tile_hw]
    last_full = valid_last // acc_lanes
    last_partial = valid_last - last_full * acc_lanes

    if last_full == chunks_per_tile and last_partial == 0:
        # HW divides evenly: one unmasked hot path for every grid step.
        _accumulate(x_ref, sum_acc, max_acc, chunks_per_tile, 0, acc_lanes)
    else:
        # Unmasked hot path for all tiles but the last; masking ops only ever
        # execute on the final HW step.
        @pl.when(hw_i < n_hw - 1)
        def _hot():
            _accumulate(x_ref, sum_acc, max_acc, chunks_per_tile, 0, acc_lanes)

        @pl.when(hw_i == n_hw - 1)
        def _tail():
            _accumulate(x_ref, sum_acc, max_acc, last_full, last_partial,
                        acc_lanes)

    @pl.when(hw_i == n_hw - 1)
    def _finalize():
        # One cross-lane reduce per batch tile (XLU), then the fused tiny MLP.
        # NOTE: the running sum is a single f32 accumulator over all of HW, so
        # for extremely large H*W it is marginally less accurate than a
        # pairwise reduction (fine at normal kernel tolerances).
        s = jnp.sum(sum_acc[...], axis=-1)                       # (rows,)
        m = jnp.max(max_acc[...], axis=-1).astype(jnp.float32)   # (rows,)
        avg = s.reshape(b_blk, channels) * jnp.float32(1.0 / hw_total)
        mx = m.reshape(b_blk, channels)
        # Fuse both MLP passes into a single (2*b_blk, C) operand.
        stacked = jnp.concatenate([avg, mx], axis=0)
        w1t = w1t_ref[...].astype(jnp.float32)
        w2t = w2t_ref[...].astype(jnp.float32)
        h = jnp.tanh(jnp.dot(stacked, w1t, preferred_element_type=jnp.float32))
        y = jnp.dot(h, w2t, preferred_element_type=jnp.float32)
        out = jax.nn.sigmoid(y[:b_blk] + y[b_blk:])
        out_ref[...] = out.astype(out_ref.dtype)


def _vmem_plan():
    """Per-x-buffer byte budget + scoped-VMEM limit derived from the physical
    VMEM of the current chip (v7x: 64 MiB, v5e/v6e: 128 MiB)."""
    cap = None
    try:
        cap = getattr(pltpu.get_tpu_info(), "vmem_capacity_bytes", None)
    except Exception:
        cap = None
    if not cap:
        cap = 64 << 20          # assume the smallest (v7x) -> portable default
    vmem_limit = min((cap * 3) // 4, 96 << 20)
    per_buf = min(16 << 20, max(4 << 20, (vmem_limit - (8 << 20)) // 2))
    return per_buf, vmem_limit


def _choose_tile_hw(hw, itemsize, rows, budget_bytes):
    """Largest lane-aligned (multiple of 128) HW tile whose single buffer
    stays under budget_bytes; tiny spatial extents use one full-extent tile."""
    if hw < 128:
        return hw
    max_elems = max(128, budget_bytes // max(1, rows * itemsize))
    tile = (max_elems // 128) * 128
    return max(128, min(tile, (hw // 128) * 128))


def _choose_b_blk(B, C, hw, itemsize, per_buf):
    """Batch tile: multiple of 8 (sublane rule on the output block) or the
    whole batch; prefer >= 2 batch tiles so the 'parallel' axis can shard
    across TensorCores (v7x megacore); keep the x block within budget."""
    min_tile = hw if hw < 128 else 128

    def fits(b):
        return b * C * min_tile * itemsize <= per_buf

    cands = [b for b in range(8, B + 1, 8) if B % b == 0]
    if B not in cands:
        cands.append(B)
    two_tiles = [b for b in cands if fits(b) and B // b >= 2]
    if two_tiles:
        return max(two_tiles)
    any_fit = [b for b in cands if fits(b)]
    if any_fit:
        return max(any_fit)
    return min(cands)


def channel_attention(x, fc1_w, fc2_w, *, tile_hw=None, b_blk=None):
    """x: (B, C, H, W); fc1_w: (Cr, C, 1, 1); fc2_w: (C, Cr, 1, 1).
    Returns sigmoid(fc2(tanh(fc1(avgpool(x)))) + fc2(tanh(fc1(maxpool(x)))))
    of shape (B, C, 1, 1), matching the PyTorch ChannelAttention module."""
    B, C, H, W = x.shape
    HW = H * W
    Cr = fc1_w.shape[0]
    itemsize = jnp.dtype(x.dtype).itemsize

    # Glue: fold (B, C) into one sublane axis, flatten spatial, drop the 1x1
    # conv kernel dims, pre-transpose weights to right-matmul form.
    x2d = x.reshape(B * C, HW)
    w1t = fc1_w.reshape(Cr, C).T    # (C, Cr)
    w2t = fc2_w.reshape(C, Cr).T    # (Cr, C)

    per_buf, vmem_limit = _vmem_plan()

    if b_blk is None:
        b_blk = _choose_b_blk(B, C, HW, itemsize, per_buf)
    assert B % b_blk == 0, "batch tile must divide batch"
    assert b_blk % 8 == 0 or b_blk == B, (
        "batch tile must be a multiple of 8 (sublane rule) or the full batch")
    rows_blk = b_blk * C

    if tile_hw is None:
        tile_hw = _choose_tile_hw(HW, itemsize, rows_blk, per_buf)
    assert tile_hw % 128 == 0 or tile_hw == HW, (
        "tile_hw must be a multiple of 128 or the full spatial extent")
    acc_lanes = tile_hw if tile_hw < 128 else 128

    grid = (B // b_blk, pl.cdiv(HW, tile_hw))

    kernel = functools.partial(
        _channel_attention_kernel,
        hw_total=HW, tile_hw=tile_hw, acc_lanes=acc_lanes,
        b_blk=b_blk, channels=C)

    # Advisory: large HBM-bound stream (flops/transcendentals negligible).
    cost = pl.CostEstimate(
        flops=2 * B * C * HW + 8 * B * C * Cr,
        transcendentals=2 * B * Cr + B * C,
        bytes_accessed=int(x.size) * itemsize
        + int(w1t.size + w2t.size) * jnp.dtype(w1t.dtype).itemsize
        + B * C * itemsize,
    )

    out = pl.pallas_call(
        kernel,
        out_shape=jax.ShapeDtypeStruct((B, C), x.dtype),
        grid_spec=pltpu.PrefetchScalarGridSpec(
            num_scalar_prefetch=0,
            grid=grid,
            in_specs=[
                # Streamed activation tiles (B*C folded into the sublane axis).
                pl.BlockSpec((rows_blk, tile_hw), lambda b, hw: (b, hw)),
                # Weights: constant block index -> VMEM-resident, no re-DMA.
                pl.BlockSpec((C, Cr), lambda b, hw: (0, 0)),
                pl.BlockSpec((Cr, C), lambda b, hw: (0, 0)),
            ],
            out_specs=pl.BlockSpec((b_blk, C), lambda b, hw: (b, 0)),
            scratch_shapes=[
                pltpu.VMEM((rows_blk, acc_lanes), jnp.float32),  # running sum
                pltpu.VMEM((rows_blk, acc_lanes), x.dtype),      # running max
            ],
        ),
        compiler_params=pltpu.CompilerParams(
            dimension_semantics=("parallel", "arbitrary"),
            vmem_limit_bytes=int(vmem_limit),
        ),
        cost_estimate=cost,
    )(x2d, w1t, w2t)

    # TODO(synk): when B*C is so small that the batch grid collapses to one
    # tile, an extra parallel split of the HW axis (per-core partial sum/max
    # combined afterwards) would keep v7x's second TensorCore busy.
    return out.reshape(B, C, 1, 1)


def _reference(x, fc1_w, fc2_w):
    # Pure-JAX reference mirroring the PyTorch forward.
    B, C, H, W = x.shape
    Cr = fc1_w.shape[0]
    w1 = fc1_w.reshape(Cr, C)
    w2 = fc2_w.reshape(C, Cr)
    avg = jnp.mean(x, axis=(2, 3))
    mx = jnp.max(x, axis=(2, 3))

    def mlp(v):
        return jnp.tanh(v @ w1.T) @ w2.T

    return jax.nn.sigmoid(mlp(avg) + mlp(mx)).reshape(B, C, 1, 1)


if __name__ == "__main__":
    B, C = 2, 4
    reduction_ratio = 4
    Cr = max(1, C // reduction_ratio)

    key = jax.random.PRNGKey(0)
    kx, k1, k2, kx2 = jax.random.split(key, 4)
    # Conv2d weight shapes: (out, in, 1, 1), bias=False.
    fc1_w = jax.random.normal(k1, (Cr, C, 1, 1), dtype=jnp.float32) * 0.5
    fc2_w = jax.random.normal(k2, (C, Cr, 1, 1), dtype=jnp.float32) * 0.5

    # Case 1: HW = 256 -> single tile, two unmasked 128-lane chunks.
    x = jax.random.normal(kx, (B, C, 16, 16), dtype=jnp.float32)
    out = jax.block_until_ready(channel_attention(x, fc1_w, fc2_w))
    ref = _reference(x, fc1_w, fc2_w)
    assert out.shape == (B, C, 1, 1)
    assert jnp.allclose(out, ref, atol=1e-5, rtol=1e-5)

    # Case 1b: same input with a forced 128-wide tile -> multi-step HW grid
    # exercising the resident accumulators across grid iterations (unmasked).
    out_b = jax.block_until_ready(
        channel_attention(x, fc1_w, fc2_w, tile_hw=128))
    assert jnp.allclose(out_b, ref, atol=1e-5, rtol=1e-5)

    # Case 2: ragged HW (15*15 = 225) -> unmasked hot tile + masked last chunk.
    x2 = jax.random.normal(kx2, (B, C, 15, 15), dtype=jnp.float32)
    out2 = jax.block_until_ready(channel_attention(x2, fc1_w, fc2_w))
    ref2 = _reference(x2, fc1_w, fc2_w)
    assert out2.shape == (B, C, 1, 1)
    assert jnp.allclose(out2, ref2, atol=1e-5, rtol=1e-5)

    print("KERNEL_OK")
</pallas_src>

<mosaic_0001>
module attributes {stable_mosaic.version = 11 : i64} {
  func.func @_channel_attention_kernel(%arg0: i32, %arg1: i32, %arg2: memref<8x256xf32, #tpu.memory_space<vmem>>, %arg3: memref<4x1xf32, #tpu.memory_space<vmem>>, %arg4: memref<1x4xf32, #tpu.memory_space<vmem>>, %arg5: memref<2x4xf32, #tpu.memory_space<vmem>>, %arg6: memref<8x128xf32, #tpu.memory_space<vmem>>, %arg7: memref<8x128xf32, #tpu.memory_space<vmem>>) attributes {dimension_semantics = [#tpu.dimension_semantics<parallel>, #tpu.dimension_semantics<arbitrary>], iteration_bounds = array<i64: 1, 1>, scalar_prefetch = 0 : i64, scratch_operands = 2 : i64, tpu.core_type = #tpu.core_type<tc>, window_params = [{transform_indices = @transform_0, window_bounds = array<i64: 8, 256>}, {pipeline_mode = #tpu.pipeline_mode<synchronous>, transform_indices = @transform_1, window_bounds = array<i64: 4, 1>}, {pipeline_mode = #tpu.pipeline_mode<synchronous>, transform_indices = @transform_2, window_bounds = array<i64: 1, 4>}, {transform_indices = @transform_3, window_bounds = array<i64: 2, 4>}]} {
    %c0_i32 = arith.constant 0 : i32
    %0 = arith.cmpi eq, %arg1, %c0_i32 : i32
    %1 = arith.extui %0 : i1 to i32
    %c0_i32_0 = arith.constant 0 : i32
    %2 = arith.cmpi ne, %1, %c0_i32_0 : i32
    scf.if %2 {
      %cst = arith.constant 0.000000e+00 : f32
      %20 = vector.broadcast %cst : f32 to vector<8x128xf32>
      %c0_21 = arith.constant 0 : index
      %c0_22 = arith.constant 0 : index
      %21 = vector.load %arg6[%c0_21, %c0_22] : memref<8x128xf32, #tpu.memory_space<vmem>>, vector<8x128xf32>
      tpu.vector_store %arg6[%c0_21, %c0_22], %20 {strides = array<i32>} : memref<8x128xf32, #tpu.memory_space<vmem>>, vector<8x128xf32>,
      %cst_23 = arith.constant 0xFF800000 : f32
      %22 = vector.broadcast %cst_23 : f32 to vector<8x128xf32>
      %c0_24 = arith.constant 0 : index
      %c0_25 = arith.constant 0 : index
      %23 = vector.load %arg7[%c0_24, %c0_25] : memref<8x128xf32, #tpu.memory_space<vmem>>, vector<8x128xf32>
      tpu.vector_store %arg7[%c0_24, %c0_25], %22 {strides = array<i32>} : memref<8x128xf32, #tpu.memory_space<vmem>>, vector<8x128xf32>,
    } else {
    }
    %c0 = arith.constant 0 : index
    %c0_1 = arith.constant 0 : index
    %3 = vector.load %arg2[%c0, %c0_1] : memref<8x256xf32, #tpu.memory_space<vmem>>, vector<8x128xf32>
    %c0_2 = arith.constant 0 : index
    %c0_3 = arith.constant 0 : index
    %4 = vector.load %arg6[%c0_2, %c0_3] : memref<8x128xf32, #tpu.memory_space<vmem>>, vector<8x128xf32>
    %5 = arith.addf %4, %3 : vector<8x128xf32>
    %c0_4 = arith.constant 0 : index
    %c0_5 = arith.constant 0 : index
    %6 = vector.load %arg6[%c0_4, %c0_5] : memref<8x128xf32, #tpu.memory_space<vmem>>, vector<8x128xf32>
    tpu.vector_store %arg6[%c0_4, %c0_5], %5 {strides = array<i32>} : memref<8x128xf32, #tpu.memory_space<vmem>>, vector<8x128xf32>,
    %c0_6 = arith.constant 0 : index
    %c0_7 = arith.constant 0 : index
    %7 = vector.load %arg7[%c0_6, %c0_7] : memref<8x128xf32, #tpu.memory_space<vmem>>, vector<8x128xf32>
    %8 = arith.maximumf %7, %3 : vector<8x128xf32>
    %c0_8 = arith.constant 0 : index
    %c0_9 = arith.constant 0 : index
    %9 = vector.load %arg7[%c0_8, %c0_9] : memref<8x128xf32, #tpu.memory_space<vmem>>, vector<8x128xf32>
    tpu.vector_store %arg7[%c0_8, %c0_9], %8 {strides = array<i32>} : memref<8x128xf32, #tpu.memory_space<vmem>>, vector<8x128xf32>,
    %c0_10 = arith.constant 0 : index
    %c128 = arith.constant 128 : index
    %10 = vector.load %arg2[%c0_10, %c128] : memref<8x256xf32, #tpu.memory_space<vmem>>, vector<8x128xf32>
    %c0_11 = arith.constant 0 : index
    %c0_12 = arith.constant 0 : index
    %11 = vector.load %arg6[%c0_11, %c0_12] : memref<8x128xf32, #tpu.memory_space<vmem>>, vector<8x128xf32>
    %12 = arith.addf %11, %10 : vector<8x128xf32>
    %c0_13 = arith.constant 0 : index
    %c0_14 = arith.constant 0 : index
    %13 = vector.load %arg6[%c0_13, %c0_14] : memref<8x128xf32, #tpu.memory_space<vmem>>, vector<8x128xf32>
    tpu.vector_store %arg6[%c0_13, %c0_14], %12 {strides = array<i32>} : memref<8x128xf32, #tpu.memory_space<vmem>>, vector<8x128xf32>,
    %c0_15 = arith.constant 0 : index
    %c0_16 = arith.constant 0 : index
    %14 = vector.load %arg7[%c0_15, %c0_16] : memref<8x128xf32, #tpu.memory_space<vmem>>, vector<8x128xf32>
    %15 = arith.maximumf %14, %10 : vector<8x128xf32>
    %c0_17 = arith.constant 0 : index
    %c0_18 = arith.constant 0 : index
    %16 = vector.load %arg7[%c0_17, %c0_18] : memref<8x128xf32, #tpu.memory_space<vmem>>, vector<8x128xf32>
    tpu.vector_store %arg7[%c0_17, %c0_18], %15 {strides = array<i32>} : memref<8x128xf32, #tpu.memory_space<vmem>>, vector<8x128xf32>,
    %c0_i32_19 = arith.constant 0 : i32
    %17 = arith.cmpi eq, %arg1, %c0_i32_19 : i32
    %18 = arith.extui %17 : i1 to i32
    %c0_i32_20 = arith.constant 0 : i32
    %19 = arith.cmpi ne, %18, %c0_i32_20 : i32
    scf.if %19 {
      %c0_21 = arith.constant 0 : index
      %c0_22 = arith.constant 0 : index
      %20 = vector.load %arg6[%c0_21, %c0_22] : memref<8x128xf32, #tpu.memory_space<vmem>>, vector<8x128xf32>
      %cst = arith.constant dense<0.000000e+00> : vector<8xf32>
      %21 = vector.multi_reduction <add>, %20, %cst [1] : vector<8x128xf32> to vector<8xf32>
      %c0_23 = arith.constant 0 : index
      %c0_24 = arith.constant 0 : index
      %22 = vector.load %arg7[%c0_23, %c0_24] : memref<8x128xf32, #tpu.memory_space<vmem>>, vector<8x128xf32>
      %cst_25 = arith.constant dense<0xFF800000> : vector<8xf32>
      %23 = vector.multi_reduction <maximumf>, %22, %cst_25 [1] : vector<8x128xf32> to vector<8xf32>
      %24 = vector.shape_cast %21 : vector<8xf32> to vector<2x4xf32>
      %cst_26 = arith.constant 3.906250e-03 : f32
      %25 = vector.broadcast %cst_26 : f32 to vector<2x4xf32>
      %26 = arith.mulf %24, %25 : vector<2x4xf32>
      %27 = vector.shape_cast %23 : vector<8xf32> to vector<2x4xf32>
      %28 = tpu.concatenate %26, %27 in 0 : vector<2x4xf32>, vector<2x4xf32> -> vector<4x4xf32>
      %c0_27 = arith.constant 0 : index
      %c0_28 = arith.constant 0 : index
      %29 = vector.load %arg3[%c0_27, %c0_28] : memref<4x1xf32, #tpu.memory_space<vmem>>, vector<4x1xf32>
      %c0_29 = arith.constant 0 : index
      %c0_30 = arith.constant 0 : index
      %30 = vector.load %arg4[%c0_29, %c0_30] : memref<1x4xf32, #tpu.memory_space<vmem>>, vector<1x4xf32>
      %cst_31 = arith.constant dense<0.000000e+00> : vector<4x1xf32>
      %31 = tpu.matmul %28, %29, %cst_31 {dimension_numbers = #tpu.dot_dimension_numbers<[1], [0], [0], [1], [0, 0, 1, 1], [], []>} : vector<4x4xf32>, vector<4x1xf32>, vector<4x1xf32> -> vector<4x1xf32>
      %32 = math.tanh %31 : vector<4x1xf32>
      %cst_32 = arith.constant dense<0.000000e+00> : vector<4x4xf32>
      %33 = tpu.matmul %32, %30, %cst_32 {dimension_numbers = #tpu.dot_dimension_numbers<[1], [0], [0], [1], [0, 0, 1, 1], [], []>} : vector<4x1xf32>, vector<1x4xf32>, vector<4x4xf32> -> vector<4x4xf32>
      %34 = vector.extract_strided_slice %33 {offsets = [0, 0], sizes = [2, 4], strides = [1, 1]} : vector<4x4xf32> to vector<2x4xf32>
      %35 = vector.extract_strided_slice %33 {offsets = [2, 0], sizes = [2, 4], strides = [1, 1]} : vector<4x4xf32> to vector<2x4xf32>
      %36 = arith.addf %34, %35 : vector<2x4xf32>
      %37 = arith.negf %36 : vector<2x4xf32>
      %38 = math.exp %37 : vector<2x4xf32>
      %cst_33 = arith.constant 1.000000e+00 : f32
      %39 = vector.broadcast %cst_33 : f32 to vector<2x4xf32>
      %40 = arith.addf %39, %38 : vector<2x4xf32>
      %41 = arith.divf %39, %40 : vector<2x4xf32>
      %c0_34 = arith.constant 0 : index
      %c0_35 = arith.constant 0 : index
      %42 = vector.load %arg5[%c0_34, %c0_35] : memref<2x4xf32, #tpu.memory_space<vmem>>, vector<2x4xf32>
      tpu.vector_store %arg5[%c0_34, %c0_35], %41 {strides = array<i32>} : memref<2x4xf32, #tpu.memory_space<vmem>>, vector<2x4xf32>,
    } else {
    }
    return
  }
  func.func @transform_0(%arg0: i32, %arg1: i32) -> (i32, i32) {
    %c0_i32 = arith.constant 0 : i32
    return %arg0, %arg1 : i32, i32
  }
  func.func @transform_1(%arg0: i32, %arg1: i32) -> (i32, i32) {
    %c0_i32 = arith.constant 0 : i32
    %c0_i32_0 = arith.constant 0 : i32
    %c0_i32_1 = arith.constant 0 : i32
    return %c0_i32, %c0_i32_0 : i32, i32
  }
  func.func @transform_2(%arg0: i32, %arg1: i32) -> (i32, i32) {
    %c0_i32 = arith.constant 0 : i32
    %c0_i32_0 = arith.constant 0 : i32
    %c0_i32_1 = arith.constant 0 : i32
    return %c0_i32, %c0_i32_0 : i32, i32
  }
  func.func @transform_3(%arg0: i32, %arg1: i32) -> (i32, i32) {
    %c0_i32 = arith.constant 0 : i32
    %c0_i32_0 = arith.constant 0 : i32
    return %arg0, %c0_i32 : i32, i32
  }
}

</mosaic_0001>

<bundles_post_ra>
// kernel: tpu_custom_call.1
= control target key start
LH: loop header
LB: loop body
LE: loop exit
PB: predicated region body
PF: predicated region fallthrough
CT: control target
= control target key end

     0   :  { %8 = vsyncpa [#allocation5], 0  ;;  %s455_s0 = inlined_call_operand.hbm [shape: f32[8,256], index: 0, kind: input, shape index: {}]   ;;  %s456_s1 = inlined_call_operand.vmem [shape: f32[4,1], index: 1, kind: input, shape index: {}]   ;;  %s457_s2 = inlined_call_operand.vmem [shape: f32[1,4], index: 2, kind: input, shape index: {}]   ;;  %s458_s3 = inlined_call_operand.hbm [shape: f32[2,4], index: 3, kind: output, shape index: {}]  }
   0x1   :  { %9 = vsyncpa [#allocation6], 0  ;;  %s398_s12 = smov [#allocation4]   ;;  %s350_s16 = scalar_lea.hbm %s455_s0, 256 }
   0x2   :  { %s16_s13 = sshll.u32 %s398_s12, 4  ;;  %p351_p0 = scmp.ne.s32.totalorder %s455_s0, %s350_s16  ;;  %s17_s13 = int_to_ptr.vmem [resolvable:$true] %s16_s13 }
   0x3   :  { %p354_p1 = scmp.lt.u32.totalorder %s350_s16, %s455_s0 }
   0x5   :  { %p356_p2 = pnand %p354_p1, %p351_p0 }
   0x7   :  { %359 = shalt.err (!%p356_p2)
}
   0x8   :  { %s360_s21 = scalar_lea.vmem %s17_s13, 256  ;;  %p365_p4 = scmp.lt.s32.totalorder %s17_s13, %s17_s13 }
   0x9   :  { %p361_p3 = scmp.ne.s32.totalorder %s17_s13, %s360_s21  ;;  %p366_p5 = scmp.lt.s32.totalorder %s360_s21, %s360_s21 }
   0xb   :  { %p367_p6 = por %p366_p5, %p365_p4 }
   0xd   :  { %p368_p7 = pnand %p367_p6, %p361_p3 }
   0xf   :  { %371 = shalt.err (!%p368_p7)
}
  0x10   :  { %19 = dma.hbm_to_vmem [thread:$0]  %s455_s0, 256, %s17_s13, [#allocation5]  }
  0x11   :  { %394 = dma.done.wait [#allocation5], 256  }
  0x12   :  { %395 = vsyncadd [#allocation5], 4294967040  ;;  %v33_v0 = vld [vmem:[#allocation4] sm:$0xff]  ;;  %v40_v1 = vld [vmem:[#allocation4 + $0x8] sm:$0xff]  ;;  %v399_v4 = vmov 0   ;;  %v60_v5 = vlaneseq  ;;  %v402_v25 = vmov 0.0  }
  0x13   :  { %v42_v2 = vadd.f32 %v40_v1, %v33_v0  ;;  %v45_v3 = vmax.f32 %v33_v0, %v40_v1  ;;  %342 = vset.pattern.permute.xlu1 %v399_v4  ;;  %343 = vset.pattern.permute.xlu0 %v399_v4  ;;  %v400_v9 = vmov 839922192   ;;  %v401_v11 = vmov 1985246804   ;;  %v130_v26 = vld [vmem:[%s456_s1] sm:$0xf] }
  0x14   :  { %v61_v6 = vshrl.u32 %v60_v5, 7  ;;  %v99_v7 = vand.u32 127, %v60_v5  ;;  %v58_v10 = vunpack.c.l.s4 %v400_v9  ;;  %v65_v12 = vunpack.c.l.s4 %v401_v11  ;;  %325 = vmatprep.subr.mxu0 %v402_v25  ;;  %330 = vmatprep.subr.mxu1 %v402_v25  ;;  %v131_v38 = vld [vmem:[%s457_s2] sm:$0x1]  ;;  %s404_s26 = smov [#allocation7]  }
  0x15   :  { %51 = vadd.xlane.f32.xlu0 %v42_v2  ;;  %vm136_vm0 = vcmask 1043456   ;;  %vm403_vm1 = vmmov 0   ;;  %vm108_vm2 = vcmask 1041409   ;;  %vm125_vm3 = vcmask 1043459   ;;  %s307_s27 = sshll.u32 %s404_s26, 4  ;;  %s308_s27 = int_to_ptr.vmem [resolvable:$true] %s307_s27 }
  0x16   :  { %v102_v8 = vsub.s32 %v99_v7, %v61_v6  ;;  %v59_v13 = vunpack.c.0.s8 %v58_v10  ;;  %v66_v14 = vunpack.c.0.s8 %v65_v12  ;;  %326 = vmatpush3.msk.msra.mxu0 %vm136_vm0, %v130_v26  ;;  %327 = vmatprep.mubr.msk.f32.mxu0 %vm403_vm1, %v402_v25  ;;  %vm128_vm4 = vcmask 1041408   ;;  %s372_s2 = scalar_lea.vmem %s308_s27, 32  ;;  %p377_p9 = scmp.lt.s32.totalorder %s308_s27, %s308_s27 }
  0x17   :  { %332 = vmatprep.mubr.msk.f32.mxu1 %vm403_vm1, %v402_v25  ;;  %vm132_vm5 = vcmask 31744   ;;  %vm215_vm6 = vcmask 1040384   ;;  %vm211_vm7 = vcmask 7168   ;;  %vm299_vm8 = vcmask 25600   ;;  %p373_p8 = scmp.ne.s32.totalorder %s308_s27, %s372_s2  ;;  %p378_p10 = scmp.lt.s32.totalorder %s372_s2, %s372_s2 }
  0x18   :  { %v62_v15 = vsub.s32 %v59_v13, %v61_v6  ;;  %v69_v16 = vsub.s32 %v66_v14, %v61_v6  ;;  %331 = vmatpush3.msk.msra.mxu1 %vm215_vm6, %v131_v38 }
  0x19   :  { %54 = vmax.xlane.f32.xlu0 %v45_v3  ;;  %p379_p11 = por %p378_p10, %p377_p9 }
  0x1b   :  { %p380_p12 = pnand %p379_p11, %p373_p8 }
  0xa2   :  { %v52_v17 = vpop.xlane.xlu0 %51 }
  0xa3   :  { %v63_v18 = vrot.slane %v52_v17, %v62_v15  ;;  %v70_v19 = vrot.slane %v52_v17, %v69_v16 }
  0xa5   :  { %v73_v20 = vmul.f32 0.00390625, %v63_v18  ;;  %v74_v23 = vmul.f32 0.00390625, %v70_v19 }
  0xa6   :  { %v55_v21 = vpop.xlane.xlu0 %54 }
  0xa7   :  { %93 = vperm.xlu1 %342, %v73_v20   ;;  %v82_v22 = vrot.slane %v55_v21, %v62_v15  ;;  %v89_v24 = vrot.slane %v55_v21, %v69_v16 }
  0xa9   :  { %112 = vperm.xlu0 %343, %v82_v22  }
  0xab   :  { %96 = vperm.xlu1 %342, %v74_v23  }
  0xaf   :  { %115 = vperm.xlu1 %342, %v89_v24  }
 0x126   :  { %v94_v27 = vpop.permute.xlu1 %93 }
 0x127   :  { %v103_v33 = vrot.slane %v94_v27, %v102_v8 }
 0x128   :  { %v113_v29 = vpop.permute.xlu0 %112 }
 0x129   :  { %v120_v31 = vrot.slane %v113_v29, %v102_v8 }
 0x12a   :  { %v97_v28 = vpop.permute.xlu1 %96 }
 0x12b   :  { %v107_v30 = vrot.slane %v97_v28, %v102_v8 }
 0x12d   :  { %v109_v35 = vsel %vm108_vm2, %v107_v30, %v103_v33 }
 0x12e   :  { %v116_v32 = vpop.permute.xlu1 %115 }
 0x12f   :  { %v124_v34 = vrot.slane %v116_v32, %v102_v8 }
 0x131   :  { %v126_v36 = vsel %vm125_vm3, %v124_v34, %v120_v31 }
 0x132   :  { %v129_v37 = vsel %vm128_vm4, %v109_v35, %v126_v36 }
 0x133   :  { %328 = vmatmul.mubr.msk.f32.vlgmr.msra.gmra.mrb[0].mxu0 %vm132_vm5, %v129_v37 }
 0x206   :  { %v206_v39 = vpop.f32.mrb[0].mxu0 }
 0x207   :  { %344 = vtanh.f32 %v206_v39  ;;  %v329_v40 = vpop.f32.mrb[1].mxu0 }
 0x211   :  { %v345_v41 = vpop.eup %344 }
 0x212   :  { %333 = vmatmul.mubr.msk.f32.vlgmr.msra.gmra.mrb[0].mxu1 %vm211_vm7, %v345_v41 }
 0x2e5   :  { %v285_v42 = vpop.f32.mrb[0].mxu1 }
 0x2e6   :  { %v290_v43 = vrot.slane %v285_v42, 2  ;;  %v334_v44 = vpop.f32.mrb[1].mxu1 }
 0x2e8   :  { %v292_v45 = vadd.f32 %v290_v43, %v285_v42 }
 0x2ea   :  { %v320_v46 = vmul.f32 -1.442695, %v292_v45 }
 0x2ec   :  { %346 = vpow2.f32 %v320_v46 }
 0x2f6   :  { %v347_v47 = vpop.eup %346 }
 0x2f7   :  { %v296_v48 = vadd.f32 1.0, %v347_v47 }
 0x2f9   :  { %348 = vrcp.f32 %v296_v48 }
 0x303   :  { %v349_v49 = vpop.eup %348 }
 0x304   :  { %300 = vst.msk [vmem:[#allocation7] sm:$0x3] %vm299_vm8, %v349_v49 }
 0x305   :  { %383 = shalt.err (!%p380_p12)
}
 0x306   :  { %s384_s30 = scalar_lea.hbm %s458_s3, 32 }
 0x307   :  { %p385_p13 = scmp.ne.s32.totalorder %s458_s3, %s384_s30  ;;  %p388_p0 = scmp.lt.u32.totalorder %s384_s30, %s458_s3 }
 0x309   :  { %p390_p1 = pnand %p388_p0, %p385_p13 }
 0x30b   :  { %393 = shalt.err (!%p390_p1)
}
 0x30c   :  { %310 = dma.vmem_to_hbm [thread:$0]  %s308_s27, 32, %s458_s3, [#allocation6]  }
 0x30d   :  { %396 = dma.done.wait [#allocation6], 32  }
 0x30e   :  { %397 = vsyncadd [#allocation6], 4294967264 }
 0x30f   :  { %314 = vsyncpa [#allocation5], 1 }
 0x310   :  { %315 = vsyncpa [#allocation6], 1 }

</bundles_post_ra>
